<compile_context>
chip_gen: v5e
topology: v5e:2x2
jax: 0.10.0
libtpu: 0.0.40
codegen_flags: <defaults>
</compile_context>

<pallas_src>
import numpy as np
import jax
import jax.numpy as jnp
from jax import lax
from jax.experimental import pallas as pl
from jax.experimental.pallas import tpu as pltpu


def waveblock_kernel(x_ref, d_ref, w_ref, b_ref, o_ref):
    # x_ref: (Bt*C_in, L)     flattened batch-block of inputs (row-major by batch)
    # d_ref: (L, L)           Haar DWT + concat(xl, xh) matrix
    # w_ref: (C_out, 3*C_in)  fused conv weights, column index = k*C_in + i
    # b_ref: (C_out, 1)       conv bias
    # o_ref: (Bt, C_out, L)   output block
    rows, L = x_ref.shape
    bt, c_out, _ = o_ref.shape
    c_in = rows // bt

    # Haar DWT (mode='zero', even L) + concat along L for ALL batch rows of the
    # block as one (Bt*C_in, L) x (L, L) MXU matmul.
    x2 = jnp.dot(x_ref[...], d_ref[...], preferred_element_type=jnp.float32)

    # Conv neighbours x2[l-1] / x2[l+1]: XLU lane rotation + boundary mask
    # (no lane-offset concatenates -> no unaligned VMEM copies).
    lane = lax.broadcasted_iota(jnp.int32, (rows, L), 1)
    zero = jnp.zeros_like(x2)
    x2m = jnp.where(lane == 0, zero, pltpu.roll(x2, shift=1, axis=1))       # x2[l-1]
    x2p = jnp.where(lane == L - 1, zero, pltpu.roll(x2, shift=L - 1, axis=1))  # x2[l+1]

    # Bias broadcast hoisted once per block (JAX does not CSE broadcast_in_dim).
    bias = jnp.broadcast_to(b_ref[...].astype(jnp.float32), (c_out, L))
    w_f = w_ref[...]                                   # (C_out, 3*C_in)

    # Fused k=3 conv: per batch row a single (C_out, 3*C_in) x (3*C_in, L) matmul
    # (K = 3*C_in instead of three K = C_in dots), bias folded into the epilogue.
    for bi in range(bt):                               # static unroll, bt is small
        r0 = bi * c_in
        xs = jnp.concatenate(
            [x2m[r0:r0 + c_in], x2[r0:r0 + c_in], x2p[r0:r0 + c_in]], axis=0)
        out_b = jnp.dot(w_f, xs, preferred_element_type=jnp.float32) + bias
        o_ref[bi] = out_b.astype(o_ref.dtype)


def _pick_block_b(batch, c_in, L, itemsize=4):
    """Batch rows per grid step.

    Picks bt such that: bt divides batch, the flattened (bt*C_in, L) input block
    keeps an 8-aligned sublane dim (or covers the whole array), the block stays
    VMEM-modest and the in-kernel unroll bounded, and there are >= 2 grid steps
    when possible (so both v7x TensorCores get work).
    """
    cands = []
    for bt in range(1, batch + 1):
        if batch % bt:
            continue
        if (bt * c_in) % 8 != 0 and bt != batch:
            continue
        if bt > 32:
            continue
        if bt * c_in * L * itemsize > (4 << 20):
            continue
        cands.append(bt)
    if not cands:
        return batch                     # full-array block is always layout-legal
    multi = [bt for bt in cands if batch // bt >= 2]
    return max(multi) if multi else max(cands)


def waveblock_forward(x, dwt_mat, w_fused, b_col, *, block_b=None):
    B, C_in, L = x.shape
    C_out = w_fused.shape[0]
    if block_b is None:
        block_b = _pick_block_b(B, C_in, L, x.dtype.itemsize)
    assert B % block_b == 0, (B, block_b)
    grid = (B // block_b,)

    # Free row-major reshape: rows grouped by batch, so one grid block is a
    # contiguous (block_b*C_in, L) slab and the in-kernel DWT matmul is flat.
    x_flat = x.reshape(B * C_in, L)

    return pl.pallas_call(
        waveblock_kernel,
        out_shape=jax.ShapeDtypeStruct((B, C_out, L), x.dtype),
        grid_spec=pltpu.PrefetchScalarGridSpec(
            num_scalar_prefetch=0,
            grid=grid,
            in_specs=[
                pl.BlockSpec((block_b * C_in, L), lambda bi: (bi, 0)),
                pl.BlockSpec((L, L), lambda bi: (0, 0)),            # revisited block
                pl.BlockSpec((C_out, 3 * C_in), lambda bi: (0, 0)),
                pl.BlockSpec((C_out, 1), lambda bi: (0, 0)),
            ],
            out_specs=pl.BlockSpec((block_b, C_out, L), lambda bi: (bi, 0, 0)),
        ),
        compiler_params=pltpu.CompilerParams(
            dimension_semantics=("parallel",),
            vmem_limit_bytes=32 * 1024 * 1024,
        ),
    )(x_flat, dwt_mat, w_fused, b_col)


def make_haar_dwt_matrix(L):
    """x2 = x @ D reproduces concat(xl, xh[0]) of DWT1DForward(J=1,'db1','zero')."""
    assert L % 2 == 0
    s = 1.0 / np.sqrt(2.0)
    D = np.zeros((L, L), dtype=np.float32)
    half = L // 2
    for n in range(half):
        D[2 * n, n] = s          # xl[n] = (x[2n] + x[2n+1]) / sqrt(2)
        D[2 * n + 1, n] = s
        D[2 * n, half + n] = s   # xh[n] = (x[2n] - x[2n+1]) / sqrt(2)
        D[2 * n + 1, half + n] = -s
    return jnp.asarray(D)


def waveblock(x, w, b, *, block_b=None):
    """WaveBlock forward. x: (B, C_in, L); w: (C_out, C_in, 3) PyTorch Conv1d
    layout; b: (C_out,). Host-side layout plumbing (free) prepares the fused
    conv weight with the contraction dim (3*C_in) last, taps k-major."""
    B, C_in, L = x.shape
    C_out = w.shape[0]
    assert L % 2 == 0, "db1/zero DWT path implemented for even L"
    dwt_mat = make_haar_dwt_matrix(L)
    w_fused = jnp.transpose(w, (0, 2, 1)).reshape(C_out, 3 * C_in)  # col = k*C_in + i
    b_col = b.reshape(C_out, 1)
    return waveblock_forward(x, dwt_mat, w_fused, b_col, block_b=block_b)


def reference_forward(x, w, b):
    """Pure-JAX reference of the PyTorch WaveBlock forward (w in (C_out,C_in,3))."""
    s = 1.0 / np.sqrt(2.0)
    xe = x[:, :, 0::2]
    xo = x[:, :, 1::2]
    x2 = jnp.concatenate([(xe + xo) * s, (xe - xo) * s], axis=-1)   # (B, C_in, L)
    out = lax.conv_general_dilated(
        x2, w, window_strides=(1,), padding=((1, 1),),
        dimension_numbers=("NCH", "OIH", "NCH"))
    return out + b[None, :, None]


if __name__ == "__main__":
    B, C_in, C_out, L = 4, 4, 8, 128

    key = jax.random.PRNGKey(0)
    kx, kw, kb = jax.random.split(key, 3)

    x = jax.random.normal(kx, (B, C_in, L), dtype=jnp.float32)
    # nn.Conv1d(c_in, c_out, 3, padding=1) parameters in PyTorch layout.
    w = jax.random.normal(kw, (C_out, C_in, 3), dtype=jnp.float32) * 0.1
    b = jax.random.normal(kb, (C_out,), dtype=jnp.float32) * 0.1

    out = waveblock(x, w, b)
    out = jax.block_until_ready(out)

    ref = jax.block_until_ready(reference_forward(x, w, b))
    np.testing.assert_allclose(np.asarray(out), np.asarray(ref), rtol=1e-5, atol=1e-5)

    print("KERNEL_OK")
</pallas_src>

<mosaic_0001>
module attributes {stable_mosaic.version = 11 : i64} {
  func.func @waveblock_kernel(%arg0: i32, %arg1: memref<8x128xf32, #tpu.memory_space<vmem>>, %arg2: memref<128x128xf32, #tpu.memory_space<vmem>>, %arg3: memref<8x12xf32, #tpu.memory_space<vmem>>, %arg4: memref<8x1xf32, #tpu.memory_space<vmem>>, %arg5: memref<2x8x128xf32, #tpu.memory_space<vmem>>) attributes {dimension_semantics = [#tpu.dimension_semantics<parallel>], iteration_bounds = array<i64: 2>, scalar_prefetch = 0 : i64, scratch_operands = 0 : i64, tpu.core_type = #tpu.core_type<tc>, window_params = [{transform_indices = @transform_0, window_bounds = array<i64: 8, 128>}, {pipeline_mode = #tpu.pipeline_mode<synchronous>, transform_indices = @transform_1, window_bounds = array<i64: 128, 128>}, {pipeline_mode = #tpu.pipeline_mode<synchronous>, transform_indices = @transform_2, window_bounds = array<i64: 8, 12>}, {pipeline_mode = #tpu.pipeline_mode<synchronous>, transform_indices = @transform_3, window_bounds = array<i64: 8, 1>}, {transform_indices = @transform_4, window_bounds = array<i64: 2, 8, 128>}]} {
    %c0 = arith.constant 0 : index
    %c0_0 = arith.constant 0 : index
    %0 = vector.load %arg1[%c0, %c0_0] : memref<8x128xf32, #tpu.memory_space<vmem>>, vector<8x128xf32>
    %c0_1 = arith.constant 0 : index
    %c0_2 = arith.constant 0 : index
    %1 = vector.load %arg2[%c0_1, %c0_2] : memref<128x128xf32, #tpu.memory_space<vmem>>, vector<128x128xf32>
    %cst = arith.constant dense<0.000000e+00> : vector<8x128xf32>
    %2 = tpu.matmul %0, %1, %cst {dimension_numbers = #tpu.dot_dimension_numbers<[1], [0], [0], [1], [0, 0, 1, 1], [], []>} : vector<8x128xf32>, vector<128x128xf32>, vector<8x128xf32> -> vector<8x128xf32>
    %3 = tpu.iota {dimensions = array<i32: 1>} : vector<8x128xi32>
    %cst_3 = arith.constant 0.000000e+00 : f32
    %4 = vector.broadcast %cst_3 : f32 to vector<8x128xf32>
    %c0_i32 = arith.constant 0 : i32
    %5 = vector.broadcast %c0_i32 : i32 to vector<8x128xi32>
    %6 = arith.cmpi eq, %3, %5 : vector<8x128xi32>
    %c1_i32 = arith.constant 1 : i32
    %7 = tpu.dynamic_rotate %2 by %c1_i32 dim 1 : vector<8x128xf32>, i32 -> vector<8x128xf32>
    %8 = arith.select %6, %4, %7 : vector<8x128xi1>, vector<8x128xf32>
    %c127_i32 = arith.constant 127 : i32
    %9 = vector.broadcast %c127_i32 : i32 to vector<8x128xi32>
    %10 = arith.cmpi eq, %3, %9 : vector<8x128xi32>
    %c127_i32_4 = arith.constant 127 : i32
    %11 = tpu.dynamic_rotate %2 by %c127_i32_4 dim 1 : vector<8x128xf32>, i32 -> vector<8x128xf32>
    %12 = arith.select %10, %4, %11 : vector<8x128xi1>, vector<8x128xf32>
    %c0_5 = arith.constant 0 : index
    %c0_6 = arith.constant 0 : index
    %13 = vector.load %arg4[%c0_5, %c0_6] : memref<8x1xf32, #tpu.memory_space<vmem>>, vector<8x1xf32>
    %14 = vector.shape_cast %13 : vector<8x1xf32> to vector<8x1xf32>
    %15 = vector.broadcast %14 : vector<8x1xf32> to vector<8x128xf32>
    %c0_7 = arith.constant 0 : index
    %c0_8 = arith.constant 0 : index
    %16 = vector.load %arg3[%c0_7, %c0_8] : memref<8x12xf32, #tpu.memory_space<vmem>>, vector<8x12xf32>
    %17 = vector.extract_strided_slice %8 {offsets = [0, 0], sizes = [4, 128], strides = [1, 1]} : vector<8x128xf32> to vector<4x128xf32>
    %18 = vector.extract_strided_slice %2 {offsets = [0, 0], sizes = [4, 128], strides = [1, 1]} : vector<8x128xf32> to vector<4x128xf32>
    %19 = vector.extract_strided_slice %12 {offsets = [0, 0], sizes = [4, 128], strides = [1, 1]} : vector<8x128xf32> to vector<4x128xf32>
    %20 = tpu.concatenate %17, %18, %19 in 0 : vector<4x128xf32>, vector<4x128xf32>, vector<4x128xf32> -> vector<12x128xf32>
    %cst_9 = arith.constant dense<0.000000e+00> : vector<8x128xf32>
    %21 = tpu.matmul %16, %20, %cst_9 {dimension_numbers = #tpu.dot_dimension_numbers<[1], [0], [0], [1], [0, 0, 1, 1], [], []>} : vector<8x12xf32>, vector<12x128xf32>, vector<8x128xf32> -> vector<8x128xf32>
    %22 = arith.addf %21, %15 : vector<8x128xf32>
    %c0_10 = arith.constant 0 : index
    %c0_11 = arith.constant 0 : index
    %c0_12 = arith.constant 0 : index
    %23 = vector.load %arg5[%c0_10, %c0_11, %c0_12] : memref<2x8x128xf32, #tpu.memory_space<vmem>>, vector<1x8x128xf32>
    %24 = vector.shape_cast %23 : vector<1x8x128xf32> to vector<8x128xf32>
    %25 = vector.shape_cast %22 : vector<8x128xf32> to vector<1x8x128xf32>
    tpu.vector_store %arg5[%c0_10, %c0_11, %c0_12], %25 {strides = array<i32>} : memref<2x8x128xf32, #tpu.memory_space<vmem>>, vector<1x8x128xf32>,
    %26 = vector.extract_strided_slice %8 {offsets = [4, 0], sizes = [4, 128], strides = [1, 1]} : vector<8x128xf32> to vector<4x128xf32>
    %27 = vector.extract_strided_slice %2 {offsets = [4, 0], sizes = [4, 128], strides = [1, 1]} : vector<8x128xf32> to vector<4x128xf32>
    %28 = vector.extract_strided_slice %12 {offsets = [4, 0], sizes = [4, 128], strides = [1, 1]} : vector<8x128xf32> to vector<4x128xf32>
    %29 = tpu.concatenate %26, %27, %28 in 0 : vector<4x128xf32>, vector<4x128xf32>, vector<4x128xf32> -> vector<12x128xf32>
    %cst_13 = arith.constant dense<0.000000e+00> : vector<8x128xf32>
    %30 = tpu.matmul %16, %29, %cst_13 {dimension_numbers = #tpu.dot_dimension_numbers<[1], [0], [0], [1], [0, 0, 1, 1], [], []>} : vector<8x12xf32>, vector<12x128xf32>, vector<8x128xf32> -> vector<8x128xf32>
    %31 = arith.addf %30, %15 : vector<8x128xf32>
    %c1 = arith.constant 1 : index
    %c0_14 = arith.constant 0 : index
    %c0_15 = arith.constant 0 : index
    %32 = vector.load %arg5[%c1, %c0_14, %c0_15] : memref<2x8x128xf32, #tpu.memory_space<vmem>>, vector<1x8x128xf32>
    %33 = vector.shape_cast %32 : vector<1x8x128xf32> to vector<8x128xf32>
    %34 = vector.shape_cast %31 : vector<8x128xf32> to vector<1x8x128xf32>
    tpu.vector_store %arg5[%c1, %c0_14, %c0_15], %34 {strides = array<i32>} : memref<2x8x128xf32, #tpu.memory_space<vmem>>, vector<1x8x128xf32>,
    return
  }
  func.func @transform_0(%arg0: i32) -> (i32, i32) {
    %c0_i32 = arith.constant 0 : i32
    %c0_i32_0 = arith.constant 0 : i32
    return %arg0, %c0_i32 : i32, i32
  }
  func.func @transform_1(%arg0: i32) -> (i32, i32) {
    %c0_i32 = arith.constant 0 : i32
    %c0_i32_0 = arith.constant 0 : i32
    %c0_i32_1 = arith.constant 0 : i32
    return %c0_i32, %c0_i32_0 : i32, i32
  }
  func.func @transform_2(%arg0: i32) -> (i32, i32) {
    %c0_i32 = arith.constant 0 : i32
    %c0_i32_0 = arith.constant 0 : i32
    %c0_i32_1 = arith.constant 0 : i32
    return %c0_i32, %c0_i32_0 : i32, i32
  }
  func.func @transform_3(%arg0: i32) -> (i32, i32) {
    %c0_i32 = arith.constant 0 : i32
    %c0_i32_0 = arith.constant 0 : i32
    %c0_i32_1 = arith.constant 0 : i32
    return %c0_i32, %c0_i32_0 : i32, i32
  }
  func.func @transform_4(%arg0: i32) -> (i32, i32, i32) {
    %c0_i32 = arith.constant 0 : i32
    %c0_i32_0 = arith.constant 0 : i32
    %c0_i32_1 = arith.constant 0 : i32
    return %arg0, %c0_i32, %c0_i32_0 : i32, i32, i32
  }
}

</mosaic_0001>

<bundles_post_ra>
// kernel: tpu_custom_call.1
= control target key start
LH: loop header
LB: loop body
LE: loop exit
PB: predicated region body
PF: predicated region fallthrough
CT: control target
= control target key end

     0   :  { %9 = vsyncpa [#allocation3], 0  ;;  %s846_s0 = inlined_call_operand.hbm [shape: f32[16,128], index: 0, kind: input, shape index: {}]   ;;  %s847_s1 = inlined_call_operand.hbm [shape: f32[128,128], index: 1, kind: input, shape index: {}]   ;;  %s848_s2 = inlined_call_operand.vmem [shape: f32[8,12], index: 2, kind: input, shape index: {}]   ;;  %s849_s3 = inlined_call_operand.vmem [shape: f32[8,1], index: 3, kind: input, shape index: {}]   ;;  %s850_s4 = inlined_call_operand.hbm [shape: f32[4,8,128], index: 4, kind: output, shape index: {}]  }
   0x1   :  { %11 = vsyncpa [#allocation3 + $0x1], 0 }
   0x2   :  { %12 = vsyncpa [#allocation6], 0 }
   0x3   :  { %13 = vsyncpa [#allocation4], 0 }
   0x4   :  { %15 = vsyncpa [#allocation4 + $0x1], 0  ;;  %s700_s15 = smov 0   ;;  %s702_s16 = smov 0  }
   0x5   :  { %s704_s17 = smov 0   ;;  %s706_s18 = smov 0  }
   0x6 LB: > { %s152_s21 = sshll.u32 %s847_s1, 4  ;;  %s724_s22 = sadd.s32 4294967295, %s665_s18   ;;  %s665_s18 = sphi %s706_s18, %s860_s18   ;;  %s661_s17 = sphi %s704_s17, %s859_s17   ;;  %s657_s16 = sphi %s702_s16, %s858_s16   ;;  %s653_s15 = sphi %s700_s15, %s857_s15   ;;  %s153_s21 = int_to_ptr.hbm [resolvable:$true] %s152_s21 }
   0x7   : > { %p449_p0 = scmp.ge.s32.totalorder %s665_s18, 1  ;;  %p42_p1 = scmp.eq.s32.totalorder %s724_s22, 0 }
   0x8   : > { %p141_p2 = scmp.lt.s32.totalorder %s665_s18, 3  ;;  %s667_s24 = smov [#allocation5]  }
   0x9   : > { %s154_s25 = sshll.u32 %s667_s24, 4  ;;  %s668_s26 = smov 128   ;;  %s155_s25 = int_to_ptr.vmem [resolvable:$true] %s154_s25 }
   0xa   : > { %p729_p3 = pnand %p449_p0, %p141_p2  ;;  %s669_s27 = smov 8  }
   0xb   : > { %s448_s28 = sadd.s32 4294967294, %s665_s18   ;;  %s740_s29 = sadd.s32 1, %s665_s18  }
   0xc   : > { %p477_p4 = pneg %p729_p3  ;;  %s28_s30 = sadd.s32 1, %s661_s17 }
   0xd   : > { %s25_s5 = ssub.s32 %s665_s18, %s740_s29  ;;  %p35_p7 = scmp.ne.s32.totalorder %s661_s17, %s657_s16 }
   0xe   : > { %p478_p6 = pnand %p477_p4, %p42_p1  ;;  %p26_p8 = scmp.eq.s32.totalorder %s25_s5, 0 }
   0xf   : > { %p36_p9 = scmp.eq.s32.totalorder %s665_s18, 0  ;;  %p41_p10 = scmp.ne.s32.totalorder %s657_s16, %s653_s15 }
  0x10   : > { %480 = dma.hbm_to_vmem [thread:$0]  (!%p478_p6), %s153_s21, 2048, %s155_s25, [#allocation6], %s668_s26, %s668_s26, %s669_s27  }
  0x11   : > { %p128_p11 = scmp.eq.s32.totalorder %s724_s22, 1  ;;  %p756_p12 = por %p42_p1, %p41_p10 }
  0x12   : > { %s752_s6 = scalar_select %p26_p8, %s661_s17, %s28_s30  }
  0x13   : > { %p760_p13 = por %p128_p11, %p35_p7  ;;  %p134_p0 = scmp.eq.s32.totalorder %s448_s28, 1 }
  0x14   : > { %p37_p2 = por %p36_p9, %p35_p7  ;;  %s174_s9 = sand.u32 1, %s661_s17  }
  0x15   : > { %p765_p4 = por %p134_p0, %p41_p10  ;;  %p490_p6 = scmp.lt.s32.totalorder %s665_s18, 2 }
  0x16   : > { %s452_s11 = sshll.u32 %s174_s9, 3  ;;  %s453_s12 = sshll.u32 %s665_s18, 3 }
  0x17   : > { %s182_s19 = scalar_lea.hbm %s846_s0, %s453_s12  ;;  %s178_s21 = scalar_lea.vmem [#allocation2], %s452_s11 }
  0x18   : > { %s184_s20 = sshll.u32 %s182_s19, 4  ;;  %s186_s24 = sshll.u32 %s178_s21, 4  ;;  %s185_s20 = int_to_ptr.hbm [resolvable:$true] %s184_s20  ;;  %s187_s24 = int_to_ptr.vmem [resolvable:$true] %s186_s24 }
  0x19   : > { %p774_p8 = pnand %p490_p6, %p37_p2  ;;  %s175_s26 = scalar_lea.sflag [#allocation3], %s174_s9 }
  0x1a   : > { %s565_s27 = sshra.s32 %s185_s20, 4  ;;  %s572_s11 = scalar_lea.hbm %s846_s0, 16  ;;  %s566_s27 = int_to_ptr.hbm [resolvable:$true] %s565_s27 }
  0x1b   : > { %s567_s28 = scalar_lea.hbm %s566_s27, 8  ;;  %p569_p9 = pneg %p774_p8 }
  0x1c   : > { %p568_p7 = scmp.ne.s32.totalorder %s566_s27, %s567_s28  ;;  %p573_p0 = scmp.lt.s32.totalorder %s566_s27, %s846_s0 }
  0x1d   : > { %p574_p2 = scmp.lt.s32.totalorder %s572_s11, %s567_s28 }
  0x1e   : > { %p570_p10 = pnand %p569_p9, %p568_p7 }
  0x1f   : > { %p575_p6 = por %p574_p2, %p573_p0 }
  0x20   : > { %p571_p11 = pneg %p570_p10 }
  0x22   : > { %p576_p5 = pnand %p575_p6, %p571_p11 }
  0x24   : > { %579 = shalt.err (!%p576_p5)
}
  0x25   : > { %484 = dma.hbm_to_vmem [thread:$0]  (!%p774_p8), %s185_s20, 128, %s187_s24, %s175_s26  }
  0x26   : > { %195 = sbr.rel (%p729_p3) target bundleno = 470 (0x1d6), region = 36  ;;  %s791_s9 = sand.u32 (!%p729_p3), 1, %s657_s16  }
  0x27   : > { %s455_s14 = sshll.u32 (!%p729_p3), %s791_s9, 3  ;;  %s198_s19 = scalar_lea.sflag (!%p729_p3), [#allocation3], %s791_s9 }
  0x28   : > { %s795_s21 = scalar_lea.vmem (!%p729_p3), [#allocation2], %s455_s14 }
  0x2b   : > { %640 = dma.done.wait (%p756_p12), %s198_s19, 128  }
  0x2c   : > { %642 = vsyncadd (%p756_p12), %s198_s19, 4294967168 }
  0x2d   : > { %644 = dma.done.wait (%p42_p1), [#allocation6], 2048  }
  0x2e   : > { %646 = vsyncadd (%p42_p1), [#allocation6], 4294965248  ;;  %v249_v0 = vld [vmem:[#allocation5 + $0x78] sm:$0xff]  ;;  %v248_v1 = vld [vmem:[#allocation5 + $0x70] sm:$0xff]  ;;  %s670_s23 = smov 127   ;;  %s671_s7 = smov 1   ;;  %v270_v20 = vlaneseq }
  0x2f   : > { %250 = vmatpush.msra.mxu0 %v249_v0  ;;  %v247_v2 = vld [vmem:[#allocation5 + $0x68] sm:$0xff]  ;;  %v246_v3 = vld [vmem:[#allocation5 + $0x60] sm:$0xff]  ;;  %v245_v4 = vld [vmem:[#allocation5 + $0x58] sm:$0xff]  ;;  %v672_v19 = vmov 0   ;;  %vm290_vm1 = vcmask 1043456   ;;  %vm292_vm3 = vcmask 97280  }
  0x30   : > { %v244_v5 = vld [vmem:[#allocation5 + $0x50] sm:$0xff]  ;;  %v243_v6 = vld [vmem:[#allocation5 + $0x48] sm:$0xff]  ;;  %v242_v7 = vld [vmem:[#allocation5 + $0x40] sm:$0xff]  ;;  %533 = vset.pattern.permute.xlu1 %v672_v19  ;;  %534 = vset.pattern.permute.xlu0 %v672_v19  ;;  %v271_v21 = vand.u32 127, %v270_v20  ;;  %s457_s27 = sshll.u32 %s791_s9, 4  ;;  %s468_s28 = sshll.u32 %s724_s22, 4 }
  0x31   : > { %251 = vmatpush.msra.mxu0 %v248_v1  ;;  %v241_v8 = vld [vmem:[#allocation5 + $0x38] sm:$0xff]  ;;  %v240_v9 = vld [vmem:[#allocation5 + $0x30] sm:$0xff]  ;;  %v239_v10 = vld [vmem:[#allocation5 + $0x28] sm:$0xff]  ;;  %s361_s11 = scalar_lea.hbm %s850_s4, %s468_s28  ;;  %s231_s12 = scalar_lea.vmem [#allocation7], %s457_s27 }
  0x32   : > { %v238_v11 = vld [vmem:[#allocation5 + $0x20] sm:$0xff]  ;;  %v237_v12 = vld [vmem:[#allocation5 + $0x18] sm:$0xff]  ;;  %v236_v13 = vld [vmem:[#allocation5 + $0x10] sm:$0xff]  ;;  %vm276_vm0 = vcmp.eq.s32.totalorder %v271_v21, 127  ;;  %vm272_vm2 = vcmp.eq.s32.totalorder %v271_v21, 0  ;;  %s362_s13 = sshll.u32 %s231_s12, 4  ;;  %s363_s13 = int_to_ptr.vmem [resolvable:$true] %s362_s13 }
  0x33   : > { %252 = vmatpush.msra.mxu0 %v247_v2  ;;  %v235_v14 = vld [vmem:[#allocation5 + $0x8] sm:$0xff]  ;;  %v234_v15 = vld [vmem:[#allocation5] sm:$0xff]  ;;  %v233_v16 = vld [vmem:[%s795_s21] sm:$0xff]  ;;  %s364_s14 = sshll.u32 %s361_s11, 4  ;;  %s350_s19 = scalar_lea.sflag [#allocation4], %s791_s9  ;;  %s365_s14 = int_to_ptr.hbm [resolvable:$true] %s364_s14 }
  0x34   : > { %v280_v18 = vld [vmem:[%s849_s3] sm:$0xff]  ;;  %s609_s21 = sshra.s32 %s365_s14, 4  ;;  %s615_s20 = scalar_lea.hbm %s850_s4, 32  ;;  %s610_s21 = int_to_ptr.hbm [resolvable:$true] %s609_s21 }
  0x35   : > { %253 = vmatpush.msra.mxu0 %v246_v3  ;;  %283 = vperm.xlu1 %533, %v280_v18   ;;  %v286_v30 = vld [vmem:[%s848_s2] sm:$0xff]  ;;  %s611_s22 = scalar_lea.hbm %s610_s21, 16  ;;  %p616_p12 = scmp.lt.s32.totalorder %s610_s21, %s850_s4 }
  0x36   : > { %p612_p1 = scmp.ne.s32.totalorder %s610_s21, %s611_s22  ;;  %p617_p8 = scmp.lt.s32.totalorder %s615_s20, %s611_s22 }
  0x37   : > { %254 = vmatpush.msra.mxu0 %v245_v4 }
  0x38   : > { %p613_p3 = pnand %p612_p1, %p760_p13  ;;  %p618_p7 = por %p617_p8, %p616_p12 }
  0x39   : > { %255 = vmatpush.msra.mxu0 %v244_v5 }
  0x3a   : > { %p614_p5 = pneg %p613_p3 }
  0x3b   : > { %256 = vmatpush.msra.mxu0 %v243_v6 }
  0x3c   : > { %p619_p9 = pnand %p618_p7, %p614_p5 }
  0x3d   : > { %257 = vmatpush.msra.mxu0 %v242_v7 }
  0x3f   : > { %258 = vmatpush.msra.mxu0 %v241_v8 }
  0x41   : > { %259 = vmatpush.msra.mxu0 %v240_v9 }
  0x43   : > { %260 = vmatpush.msra.mxu0 %v239_v10 }
  0x45   : > { %261 = vmatpush.msra.mxu0 %v238_v11 }
  0x47   : > { %262 = vmatpush.msra.mxu0 %v237_v12 }
  0x49   : > { %263 = vmatpush.msra.mxu0 %v236_v13 }
  0x4b   : > { %264 = vmatpush.msra.mxu0 %v235_v14 }
  0x4d   : > { %265 = vmatpush.msra.mxu0 %v234_v15 }
  0x4e   : > { %266 = vmatmul.f32.vlgmr.msra.gmra.mxu0 %v233_v16 }
  0xa7   : > { %v284_v32 = vpop.permute.xlu1 %283 }
  0xcb   : > { %v267_v17 = vpop.f32.mrf.mxu0 }
  0xcc   : > { %277 = vrot.lane.b32.xlu0 %v267_v17, %s670_s23  ;;  %v288_v25 = vrot.slane %v267_v17, 4 }
  0xd4   : > { %273 = vrot.lane.b32.xlu0 %v267_v17, %s671_s7 }
 0x13e   : > { %v278_v22 = vpop.permute.xlu0 %277 }
 0x13f   : > { %v279_v23 = vsel %vm276_vm0, 0.0, %v278_v22 }
 0x140   : > { %458 = vmatpush.msk.msra.mxu1 %vm290_vm1, %v279_v23  ;;  %v323_v24 = vrot.slane %v279_v23, 4 }
 0x142   : > { %460 = vmatpush.msk.msra.mxu2 %vm290_vm1, %v323_v24 }
 0x146   : > { %v274_v26 = vpop.permute.xlu0 %273 }
 0x147   : > { %v275_v27 = vsel %vm272_vm2, 0.0, %v274_v26 }
 0x148   : > { %v321_v28 = vrot.slane %v275_v27, 4  ;;  %v291_v29 = vsel %vm290_vm1, %v275_v27, %v288_v25 }
 0x149   : > { %314 = vmatpush.msra.mxu1 %v291_v29 }
 0x14a   : > { %v324_v31 = vsel %vm290_vm1, %v321_v28, %v267_v17  ;;  %459 = vmatmul.msk.f32.vlgmr.msra.gmra.mxu1 %vm292_vm3, %v286_v30 }
 0x14b   : > { %342 = vmatpush.msra.mxu2 %v324_v31 }
 0x14c   : > { %461 = vmatmul.msk.f32.vlgmr.msra.gmra.mxu2 %vm292_vm3, %v286_v30 }
 0x1c7   : > { %v316_v33 = vpop.f32.mrf.mxu1 }
 0x1c8   : > { %v317_v34 = vadd.f32 %v316_v33, %v284_v32 }
 0x1ca   : > { %319 = vst [vmem:[%s231_s12] sm:$0xff] %v317_v34 }
 0x1cf   : > { %v344_v35 = vpop.f32.mrf.mxu2 }
 0x1d0   : > { %v345_v36 = vadd.f32 %v344_v35, %v284_v32 }
 0x1d2   : > { %462 = vst [vmem:[%s231_s12 + $0x8] sm:$0xff] %v345_v36 }
 0x1d3   : > { %622 = shalt.err (!%p619_p9)
}
 0x1d4   : > { %s673_s9 = smov 128   ;;  %s674_s26 = smov 8  }
 0x1d5   : > { %475 = dma.vmem_to_hbm [thread:$0]  (%p760_p13), %s363_s13, 256, %s365_s14, %s350_s19, %s673_s9, %s673_s9, %s674_s26  }
 0x1d6 PF: > { %s379_s27 = sand.u32 1, %s653_s15   ;;  %p856_p10 = scmp.ge.s32.totalorder %s665_s18, 2 }
 0x1d7   : > { %s380_s28 = scalar_lea.sflag [#allocation4], %s379_s27 }
 0x1d8   : > { %p486_p11 = pnand %p856_p10, %p765_p4 }
 0x1da   : > { %p487_p0 = pneg %p486_p11 }
 0x1dc   : > { %648 = dma.done.wait (%p487_p0), %s380_s28, 256  }
 0x1dd   : > { %650 = vsyncadd (%p487_p0), %s380_s28, 4294967040  ;;  %p18_p2 = scmp.ge.s32.totalorder %s740_s29, 4   ;;  %s857_s15 = smov %s657_s16 }
 0x1de   : > { %s858_s16 = smov %s661_s17  ;;  %s859_s17 = smov %s752_s6 }
 0x1df   : > { %s860_s18 = smov %s740_s29  ;;  %20 = sbr.rel (!%p18_p2) target bundleno = 6 (0x6), region = 86 }
 0x1e4   :  { %386 = vsyncpa [#allocation3], 1 }
 0x1e5   :  { %388 = vsyncpa [#allocation3 + $0x1], 1 }
 0x1e6   :  { %389 = vsyncpa [#allocation6], 1 }
 0x1e7   :  { %390 = vsyncpa [#allocation4], 1 }
 0x1e8   :  { %392 = vsyncpa [#allocation4 + $0x1], 1 }

</bundles_post_ra>
